<compile_context>
chip_gen: v5e
topology: v5e:2x2
jax: 0.10.0
libtpu: 0.0.40
codegen_flags: <defaults>
</compile_context>

<pallas_src>
import functools

import jax
import jax.numpy as jnp
from jax.experimental import pallas as pl
from jax.experimental.pallas import tpu as pltpu


def _round_up(x, m):
    return ((x + m - 1) // m) * m


def _pick_act_dtype():
    """bf16 elementwise on v6e/v7x (native bf16 VPU); f32 on v5e and older chips."""
    try:
        kind = jax.devices()[0].device_kind.lower()
    except Exception:
        return jnp.float32
    if ("v6" in kind) or ("v7" in kind):
        return jnp.bfloat16
    return jnp.float32


def _choose_batch_tiling(bs, rows_per_step=256):
    """Pick the grid-step count first (so the last tile is never mostly padding),
    keep an even number of >=2 steps (v7x megacore), tile rounded to 16 rows
    (bf16 sublane packing for intermediates and the output store)."""
    nt = max(2, pl.cdiv(bs, rows_per_step))
    if nt % 2:
        nt += 1
    tb = _round_up(pl.cdiv(bs, nt), 16)
    return tb, nt * tb, nt


def _nn_controller_kernel(
    state_ref, obst_ref, aux_ref,
    w0_ref, b0_ref,              # conv0: n_state -> 64
    w1_ref, b1_ref,              # conv1: 64 -> 128
    w2_ref, b2_ref,              # conv2: 128 -> 128
    w3a_ref, w3bc_ref, b3_ref,   # fc0 split: conv_feat block / fused [u_nominal, err] block
    w4_ref, b4_ref,              # fc1: 128 -> 64
    w5_ref, b5_ref,              # fc2 (zero-padded to n_pad lanes)
    out_ref,
    *, output_scale,
):
    k_obs, tb, n_state = obst_ref.shape
    c_out = w2_ref.shape[1]      # 128

    def mm(x, w_ref):
        # bf16 MXU operands, f32 accumulation.
        return jnp.dot(x.astype(jnp.bfloat16), w_ref[...],
                       preferred_element_type=jnp.float32)

    def layer(x, w_ref, b_ref):
        # bias-add + ReLU in the bias dtype (bf16 on v6e/v7x, f32 on v5e).
        y = mm(x, w_ref).astype(b_ref.dtype) + b_ref[...]
        return jnp.maximum(y, 0)

    state = state_ref[...]          # (TB, n_state)      f32
    obst = obst_ref[...]            # (K, TB, n_state)   f32  (obstacle-major)
    aux = aux_ref[...]              # (TB, m+n_state)    f32  ([u_nominal, state_error])

    # state_diff[k, b, :] = state[b, :] - obstacle[k, b, :]
    # TODO(synk): preprocess_func (arbitrary user callable, default None) is not translated;
    # it is treated as the identity here.
    diff = (state[None, :, :] - obst).reshape(k_obs * tb, n_state)

    # Conv tower (kernel_size=1 convs == per-row Linear) + ReLU, obstacle-major.
    h = layer(diff, w0_ref, b0_ref)       # (K*TB, 64)
    h = layer(h, w1_ref, b1_ref)          # (K*TB, 128)
    h = layer(h, w2_ref, b2_ref)          # (K*TB, 128)

    # torch.max over the obstacle axis: tree of pure-VPU maxes on (TB, 128) slabs.
    h = h.reshape(k_obs, tb, c_out)
    parts = [h[i] for i in range(k_obs)]
    while len(parts) > 1:
        nxt = [jnp.maximum(a, b) for a, b in zip(parts[::2], parts[1::2])]
        if len(parts) % 2:
            nxt.append(parts[-1])
        parts = nxt
    feat = parts[0]                        # (TB, 128)

    # fc0 on concat([feat, u_nominal, state_error]) without a concat (weights pre-split).
    y = mm(feat, w3a_ref) + mm(aux, w3bc_ref)
    h = jnp.maximum(y.astype(b3_ref.dtype) + b3_ref[...], 0)     # (TB, 128)
    h = layer(h, w4_ref, b4_ref)                                 # (TB, 64)

    # fc2 + tanh (f32 EUP) + scale; lane-dense bf16 store.
    z = mm(h, w5_ref) + b5_ref[...]                              # (TB, n_pad) f32
    out_ref[...] = (jnp.tanh(z) * output_scale).astype(out_ref.dtype)


def prepare_kernel_params(params, n_state, m_control, act_dtype=None):
    """One-time parameter prep (hoisted out of the per-call path): split fc0's weight,
    fuse the u_nominal/state_error blocks, zero-pad fc2 to a lane-dense width, cast
    MXU weights to bf16 and hidden-layer biases to the elementwise dtype."""
    if act_dtype is None:
        act_dtype = _pick_act_dtype()
    (w0, b0, w1, b1, w2, b2, w3, b3, w4, b4, w5, b5) = params
    n_pad = _round_up(max(m_control, 1), 128)

    w3a = w3[:128, :]
    w3bc = w3[128:, :]      # fused [u_nominal, state_error] block

    w5p = jnp.zeros((64, n_pad), jnp.float32).at[:, :m_control].set(w5)
    b5p = jnp.zeros((1, n_pad), jnp.float32).at[:, :m_control].set(b5)

    bf = lambda w: w.astype(jnp.bfloat16)
    ad = lambda b: b.astype(act_dtype)
    return (bf(w0), ad(b0), bf(w1), ad(b1), bf(w2), ad(b2),
            bf(w3a), bf(w3bc), ad(b3), bf(w4), ad(b4), bf(w5p), b5p)


def nn_controller_forward(state, obstacle, u_nominal, state_error, kparams,
                          output_scale=1.0, rows_per_step=256):
    """state (bs,n_state), obstacle (bs,k_obstacle,n_state), u_nominal (bs,m_control),
    state_error (bs,n_state) -> u (bs,m_control), all f32.  `kparams` comes from
    prepare_kernel_params (weights already split / padded / cast)."""
    bs, n_state = state.shape
    k_obs = obstacle.shape[1]
    m_control = u_nominal.shape[1]
    n_pad = kparams[-1].shape[1]
    m_aux = m_control + n_state

    tb, bs_pad, nt = _choose_batch_tiling(bs, rows_per_step)

    # Obstacle-major layout: (K, bs, n_state) so the per-feature max over obstacles
    # becomes a VPU tree-max over (TB, 128) slabs instead of an XLU sublane reduce.
    obst_t = jnp.transpose(obstacle, (1, 0, 2))
    aux = jnp.concatenate([u_nominal, state_error], axis=1)      # (bs, m+n_state)

    if bs_pad != bs:
        pr = bs_pad - bs
        state_p = jnp.pad(state, ((0, pr), (0, 0)))
        obst_p = jnp.pad(obst_t, ((0, 0), (0, pr), (0, 0)))
        aux_p = jnp.pad(aux, ((0, pr), (0, 0)))
    else:
        state_p, obst_p, aux_p = state, obst_t, aux

    batch_specs = [
        pl.BlockSpec((tb, n_state), lambda i: (i, 0)),
        pl.BlockSpec((k_obs, tb, n_state), lambda i: (0, i, 0)),
        pl.BlockSpec((tb, m_aux), lambda i: (i, 0)),
    ]
    # Constant index_map -> weights/biases stay VMEM-resident across grid steps.
    weight_specs = [pl.BlockSpec(w.shape, lambda i: (0, 0)) for w in kparams]

    flops_row = 2 * (k_obs * (n_state * 64 + 64 * 128 + 128 * 128)
                     + 128 * 128 + m_aux * 128 + 128 * 64 + 64 * n_pad)
    weight_bytes = sum(int(w.size) * w.dtype.itemsize for w in kparams)
    bytes_accessed = weight_bytes + bs_pad * (
        4 * (n_state + k_obs * n_state + m_aux) + 2 * n_pad)
    cost = pl.CostEstimate(flops=flops_row * bs_pad,
                           transcendentals=bs_pad * n_pad,
                           bytes_accessed=bytes_accessed)

    out_pad = pl.pallas_call(
        functools.partial(_nn_controller_kernel, output_scale=float(output_scale)),
        out_shape=jax.ShapeDtypeStruct((bs_pad, n_pad), jnp.bfloat16),
        grid=(nt,),
        in_specs=batch_specs + weight_specs,
        out_specs=pl.BlockSpec((tb, n_pad), lambda i: (i, 0)),
        compiler_params=pltpu.CompilerParams(
            dimension_semantics=("parallel",),
            vmem_limit_bytes=32 * 1024 * 1024),
        cost_estimate=cost,
    )(state_p, obst_p, aux_p, *kparams)

    # Pad rows/cols sliced off; the trailing +u_nominal stays in f32 on the tiny
    # (bs, m_control) slice and fuses with the slice/cast under jit.
    return out_pad[:bs, :m_control].astype(jnp.float32) + u_nominal


def init_params(key, n_state, m_control):
    """Deterministic init mimicking PyTorch's default U(-1/sqrt(fan_in), 1/sqrt(fan_in)).
    Weights stored as (in_features, out_features); biases as (1, out_features)."""
    def linear(k, fan_in, fan_out):
        kw, kb = jax.random.split(k)
        bound = 1.0 / jnp.sqrt(float(fan_in))
        w = jax.random.uniform(kw, (fan_in, fan_out), jnp.float32, -bound, bound)
        b = jax.random.uniform(kb, (1, fan_out), jnp.float32, -bound, bound)
        return w, b

    keys = jax.random.split(key, 6)
    w0, b0 = linear(keys[0], n_state, 64)                          # conv0
    w1, b1 = linear(keys[1], 64, 128)                              # conv1
    w2, b2 = linear(keys[2], 128, 128)                             # conv2
    w3, b3 = linear(keys[3], 128 + m_control + n_state, 128)       # fc0
    w4, b4 = linear(keys[4], 128, 64)                              # fc1
    w5, b5 = linear(keys[5], 64, m_control)                        # fc2
    return (w0, b0, w1, b1, w2, b2, w3, b3, w4, b4, w5, b5)


def reference_forward(state, obstacle, u_nominal, state_error, params, output_scale=1.0):
    """Pure-JAX f32 reference matching the PyTorch module semantics."""
    (w0, b0, w1, b1, w2, b2, w3, b3, w4, b4, w5, b5) = params
    relu = lambda z: jnp.maximum(z, 0.0)
    diff = state[:, None, :] - obstacle                  # (bs, K, n_state)
    h = relu(diff @ w0 + b0)                             # (bs, K, 64)
    h = relu(h @ w1 + b1)                                # (bs, K, 128)
    h = relu(h @ w2 + b2)                                # (bs, K, 128)
    h = jnp.max(h, axis=1)                               # (bs, 128)
    z = jnp.concatenate([h, u_nominal, state_error], axis=1)
    h = relu(z @ w3 + b3)
    h = relu(h @ w4 + b4)
    y = jnp.tanh(h @ w5 + b5) * output_scale
    return y + u_nominal


if __name__ == "__main__":
    bs = 2
    n_state = 8
    k_obstacle = 8
    m_control = 3
    output_scale = 1.0

    key = jax.random.PRNGKey(0)
    k_params, k_state, k_obs, k_unom, k_err = jax.random.split(key, 5)

    params = init_params(k_params, n_state, m_control)
    state = jax.random.normal(k_state, (bs, n_state), dtype=jnp.float32)
    obstacle = jax.random.normal(k_obs, (bs, k_obstacle, n_state), dtype=jnp.float32)
    u_nominal = jax.random.normal(k_unom, (bs, m_control), dtype=jnp.float32)
    state_error = jax.random.normal(k_err, (bs, n_state), dtype=jnp.float32)

    # One-time weight prep hoisted out of the per-call path; the forward is jitted so
    # the wrapper layout ops (transpose/pad/concat/slice/add) fuse and cache.
    kparams = prepare_kernel_params(params, n_state, m_control)
    fwd = jax.jit(functools.partial(nn_controller_forward, output_scale=output_scale))

    u = fwd(state, obstacle, u_nominal, state_error, kparams)
    u = jax.block_until_ready(u)

    u_ref = reference_forward(state, obstacle, u_nominal, state_error, params, output_scale)
    assert u.shape == (bs, m_control)
    # Tolerance relaxed vs the f32 reference: bf16 MXU operands (f32 accumulation),
    # bf16 elementwise on v6e/v7x, and a bf16 output store.
    assert jnp.allclose(u, u_ref, atol=5e-2, rtol=5e-2), "mismatch vs JAX reference"

    print("KERNEL_OK")
</pallas_src>

<mosaic_0001>
module attributes {stable_mosaic.version = 11 : i64} {
  func.func @_nn_controller_kernel(%arg0: i32, %arg1: memref<16x8xf32, #tpu.memory_space<vmem>>, %arg2: memref<8x16x8xf32, #tpu.memory_space<vmem>>, %arg3: memref<16x11xf32, #tpu.memory_space<vmem>>, %arg4: memref<8x64xbf16, #tpu.memory_space<vmem>>, %arg5: memref<1x64xf32, #tpu.memory_space<vmem>>, %arg6: memref<64x128xbf16, #tpu.memory_space<vmem>>, %arg7: memref<1x128xf32, #tpu.memory_space<vmem>>, %arg8: memref<128x128xbf16, #tpu.memory_space<vmem>>, %arg9: memref<1x128xf32, #tpu.memory_space<vmem>>, %arg10: memref<128x128xbf16, #tpu.memory_space<vmem>>, %arg11: memref<11x128xbf16, #tpu.memory_space<vmem>>, %arg12: memref<1x128xf32, #tpu.memory_space<vmem>>, %arg13: memref<128x64xbf16, #tpu.memory_space<vmem>>, %arg14: memref<1x64xf32, #tpu.memory_space<vmem>>, %arg15: memref<64x128xbf16, #tpu.memory_space<vmem>>, %arg16: memref<1x128xf32, #tpu.memory_space<vmem>>, %arg17: memref<16x128xbf16, #tpu.memory_space<vmem>>) attributes {dimension_semantics = [#tpu.dimension_semantics<parallel>], iteration_bounds = array<i64: 2>, scalar_prefetch = 0 : i64, scratch_operands = 0 : i64, tpu.core_type = #tpu.core_type<tc>, window_params = [{transform_indices = @transform_0, window_bounds = array<i64: 16, 8>}, {transform_indices = @transform_1, window_bounds = array<i64: 8, 16, 8>}, {transform_indices = @transform_2, window_bounds = array<i64: 16, 11>}, {pipeline_mode = #tpu.pipeline_mode<synchronous>, transform_indices = @transform_3, window_bounds = array<i64: 8, 64>}, {pipeline_mode = #tpu.pipeline_mode<synchronous>, transform_indices = @transform_4, window_bounds = array<i64: 1, 64>}, {pipeline_mode = #tpu.pipeline_mode<synchronous>, transform_indices = @transform_5, window_bounds = array<i64: 64, 128>}, {pipeline_mode = #tpu.pipeline_mode<synchronous>, transform_indices = @transform_6, window_bounds = array<i64: 1, 128>}, {pipeline_mode = #tpu.pipeline_mode<synchronous>, transform_indices = @transform_7, window_bounds = array<i64: 128, 128>}, {pipeline_mode = #tpu.pipeline_mode<synchronous>, transform_indices = @transform_8, window_bounds = array<i64: 1, 128>}, {pipeline_mode = #tpu.pipeline_mode<synchronous>, transform_indices = @transform_9, window_bounds = array<i64: 128, 128>}, {pipeline_mode = #tpu.pipeline_mode<synchronous>, transform_indices = @transform_10, window_bounds = array<i64: 11, 128>}, {pipeline_mode = #tpu.pipeline_mode<synchronous>, transform_indices = @transform_11, window_bounds = array<i64: 1, 128>}, {pipeline_mode = #tpu.pipeline_mode<synchronous>, transform_indices = @transform_12, window_bounds = array<i64: 128, 64>}, {pipeline_mode = #tpu.pipeline_mode<synchronous>, transform_indices = @transform_13, window_bounds = array<i64: 1, 64>}, {pipeline_mode = #tpu.pipeline_mode<synchronous>, transform_indices = @transform_14, window_bounds = array<i64: 64, 128>}, {pipeline_mode = #tpu.pipeline_mode<synchronous>, transform_indices = @transform_15, window_bounds = array<i64: 1, 128>}, {transform_indices = @transform_16, window_bounds = array<i64: 16, 128>}]} {
    %c0 = arith.constant 0 : index
    %c0_0 = arith.constant 0 : index
    %0 = vector.load %arg1[%c0, %c0_0] : memref<16x8xf32, #tpu.memory_space<vmem>>, vector<16x8xf32>
    %c0_1 = arith.constant 0 : index
    %c0_2 = arith.constant 0 : index
    %c0_3 = arith.constant 0 : index
    %1 = vector.load %arg2[%c0_1, %c0_2, %c0_3] : memref<8x16x8xf32, #tpu.memory_space<vmem>>, vector<8x16x8xf32>
    %c0_4 = arith.constant 0 : index
    %c0_5 = arith.constant 0 : index
    %2 = vector.load %arg3[%c0_4, %c0_5] : memref<16x11xf32, #tpu.memory_space<vmem>>, vector<16x11xf32>
    %3 = vector.shape_cast %0 : vector<16x8xf32> to vector<1x16x8xf32>
    %4 = vector.broadcast %3 : vector<1x16x8xf32> to vector<8x16x8xf32>
    %5 = arith.subf %4, %1 : vector<8x16x8xf32>
    %6 = vector.shape_cast %5 : vector<8x16x8xf32> to vector<128x8xf32>
    %7 = arith.truncf %6 : vector<128x8xf32> to vector<128x8xbf16>
    %c0_6 = arith.constant 0 : index
    %c0_7 = arith.constant 0 : index
    %8 = vector.load %arg4[%c0_6, %c0_7] : memref<8x64xbf16, #tpu.memory_space<vmem>>, vector<8x64xbf16>
    %cst = arith.constant dense<0.000000e+00> : vector<128x64xf32>
    %9 = tpu.matmul %7, %8, %cst {dimension_numbers = #tpu.dot_dimension_numbers<[1], [0], [0], [1], [0, 0, 1, 1], [], []>} : vector<128x8xbf16>, vector<8x64xbf16>, vector<128x64xf32> -> vector<128x64xf32>
    %c0_8 = arith.constant 0 : index
    %c0_9 = arith.constant 0 : index
    %10 = vector.load %arg5[%c0_8, %c0_9] : memref<1x64xf32, #tpu.memory_space<vmem>>, vector<1x64xf32>
    %11 = vector.broadcast %10 : vector<1x64xf32> to vector<128x64xf32>
    %12 = arith.addf %9, %11 : vector<128x64xf32>
    %cst_10 = arith.constant 0.000000e+00 : f32
    %13 = vector.broadcast %cst_10 : f32 to vector<128x64xf32>
    %14 = arith.maximumf %12, %13 : vector<128x64xf32>
    %15 = arith.truncf %14 : vector<128x64xf32> to vector<128x64xbf16>
    %c0_11 = arith.constant 0 : index
    %c0_12 = arith.constant 0 : index
    %16 = vector.load %arg6[%c0_11, %c0_12] : memref<64x128xbf16, #tpu.memory_space<vmem>>, vector<64x128xbf16>
    %cst_13 = arith.constant dense<0.000000e+00> : vector<128x128xf32>
    %17 = tpu.matmul %15, %16, %cst_13 {dimension_numbers = #tpu.dot_dimension_numbers<[1], [0], [0], [1], [0, 0, 1, 1], [], []>} : vector<128x64xbf16>, vector<64x128xbf16>, vector<128x128xf32> -> vector<128x128xf32>
    %c0_14 = arith.constant 0 : index
    %c0_15 = arith.constant 0 : index
    %18 = vector.load %arg7[%c0_14, %c0_15] : memref<1x128xf32, #tpu.memory_space<vmem>>, vector<1x128xf32>
    %19 = vector.broadcast %18 : vector<1x128xf32> to vector<128x128xf32>
    %20 = arith.addf %17, %19 : vector<128x128xf32>
    %cst_16 = arith.constant 0.000000e+00 : f32
    %21 = vector.broadcast %cst_16 : f32 to vector<128x128xf32>
    %22 = arith.maximumf %20, %21 : vector<128x128xf32>
    %23 = arith.truncf %22 : vector<128x128xf32> to vector<128x128xbf16>
    %c0_17 = arith.constant 0 : index
    %c0_18 = arith.constant 0 : index
    %24 = vector.load %arg8[%c0_17, %c0_18] : memref<128x128xbf16, #tpu.memory_space<vmem>>, vector<128x128xbf16>
    %cst_19 = arith.constant dense<0.000000e+00> : vector<128x128xf32>
    %25 = tpu.matmul %23, %24, %cst_19 {dimension_numbers = #tpu.dot_dimension_numbers<[1], [0], [0], [1], [0, 0, 1, 1], [], []>} : vector<128x128xbf16>, vector<128x128xbf16>, vector<128x128xf32> -> vector<128x128xf32>
    %c0_20 = arith.constant 0 : index
    %c0_21 = arith.constant 0 : index
    %26 = vector.load %arg9[%c0_20, %c0_21] : memref<1x128xf32, #tpu.memory_space<vmem>>, vector<1x128xf32>
    %27 = vector.broadcast %26 : vector<1x128xf32> to vector<128x128xf32>
    %28 = arith.addf %25, %27 : vector<128x128xf32>
    %cst_22 = arith.constant 0.000000e+00 : f32
    %29 = vector.broadcast %cst_22 : f32 to vector<128x128xf32>
    %30 = arith.maximumf %28, %29 : vector<128x128xf32>
    %31 = vector.shape_cast %30 : vector<128x128xf32> to vector<8x16x128xf32>
    %32 = vector.extract_strided_slice %31 {offsets = [0, 0, 0], sizes = [1, 16, 128], strides = [1, 1, 1]} : vector<8x16x128xf32> to vector<1x16x128xf32>
    %33 = vector.shape_cast %32 : vector<1x16x128xf32> to vector<16x128xf32>
    %34 = vector.extract_strided_slice %31 {offsets = [1, 0, 0], sizes = [1, 16, 128], strides = [1, 1, 1]} : vector<8x16x128xf32> to vector<1x16x128xf32>
    %35 = vector.shape_cast %34 : vector<1x16x128xf32> to vector<16x128xf32>
    %36 = vector.extract_strided_slice %31 {offsets = [2, 0, 0], sizes = [1, 16, 128], strides = [1, 1, 1]} : vector<8x16x128xf32> to vector<1x16x128xf32>
    %37 = vector.shape_cast %36 : vector<1x16x128xf32> to vector<16x128xf32>
    %38 = vector.extract_strided_slice %31 {offsets = [3, 0, 0], sizes = [1, 16, 128], strides = [1, 1, 1]} : vector<8x16x128xf32> to vector<1x16x128xf32>
    %39 = vector.shape_cast %38 : vector<1x16x128xf32> to vector<16x128xf32>
    %40 = vector.extract_strided_slice %31 {offsets = [4, 0, 0], sizes = [1, 16, 128], strides = [1, 1, 1]} : vector<8x16x128xf32> to vector<1x16x128xf32>
    %41 = vector.shape_cast %40 : vector<1x16x128xf32> to vector<16x128xf32>
    %42 = vector.extract_strided_slice %31 {offsets = [5, 0, 0], sizes = [1, 16, 128], strides = [1, 1, 1]} : vector<8x16x128xf32> to vector<1x16x128xf32>
    %43 = vector.shape_cast %42 : vector<1x16x128xf32> to vector<16x128xf32>
    %44 = vector.extract_strided_slice %31 {offsets = [6, 0, 0], sizes = [1, 16, 128], strides = [1, 1, 1]} : vector<8x16x128xf32> to vector<1x16x128xf32>
    %45 = vector.shape_cast %44 : vector<1x16x128xf32> to vector<16x128xf32>
    %46 = vector.extract_strided_slice %31 {offsets = [7, 0, 0], sizes = [1, 16, 128], strides = [1, 1, 1]} : vector<8x16x128xf32> to vector<1x16x128xf32>
    %47 = vector.shape_cast %46 : vector<1x16x128xf32> to vector<16x128xf32>
    %48 = arith.maximumf %33, %35 : vector<16x128xf32>
    %49 = arith.maximumf %37, %39 : vector<16x128xf32>
    %50 = arith.maximumf %41, %43 : vector<16x128xf32>
    %51 = arith.maximumf %45, %47 : vector<16x128xf32>
    %52 = arith.maximumf %48, %49 : vector<16x128xf32>
    %53 = arith.maximumf %50, %51 : vector<16x128xf32>
    %54 = arith.maximumf %52, %53 : vector<16x128xf32>
    %55 = arith.truncf %54 : vector<16x128xf32> to vector<16x128xbf16>
    %c0_23 = arith.constant 0 : index
    %c0_24 = arith.constant 0 : index
    %56 = vector.load %arg10[%c0_23, %c0_24] : memref<128x128xbf16, #tpu.memory_space<vmem>>, vector<128x128xbf16>
    %cst_25 = arith.constant dense<0.000000e+00> : vector<16x128xf32>
    %57 = tpu.matmul %55, %56, %cst_25 {dimension_numbers = #tpu.dot_dimension_numbers<[1], [0], [0], [1], [0, 0, 1, 1], [], []>} : vector<16x128xbf16>, vector<128x128xbf16>, vector<16x128xf32> -> vector<16x128xf32>
    %58 = arith.truncf %2 : vector<16x11xf32> to vector<16x11xbf16>
    %c0_26 = arith.constant 0 : index
    %c0_27 = arith.constant 0 : index
    %59 = vector.load %arg11[%c0_26, %c0_27] : memref<11x128xbf16, #tpu.memory_space<vmem>>, vector<11x128xbf16>
    %cst_28 = arith.constant dense<0.000000e+00> : vector<16x128xf32>
    %60 = tpu.matmul %58, %59, %cst_28 {dimension_numbers = #tpu.dot_dimension_numbers<[1], [0], [0], [1], [0, 0, 1, 1], [], []>} : vector<16x11xbf16>, vector<11x128xbf16>, vector<16x128xf32> -> vector<16x128xf32>
    %61 = arith.addf %57, %60 : vector<16x128xf32>
    %c0_29 = arith.constant 0 : index
    %c0_30 = arith.constant 0 : index
    %62 = vector.load %arg12[%c0_29, %c0_30] : memref<1x128xf32, #tpu.memory_space<vmem>>, vector<1x128xf32>
    %63 = vector.broadcast %62 : vector<1x128xf32> to vector<16x128xf32>
    %64 = arith.addf %61, %63 : vector<16x128xf32>
    %cst_31 = arith.constant 0.000000e+00 : f32
    %65 = vector.broadcast %cst_31 : f32 to vector<16x128xf32>
    %66 = arith.maximumf %64, %65 : vector<16x128xf32>
    %67 = arith.truncf %66 : vector<16x128xf32> to vector<16x128xbf16>
    %c0_32 = arith.constant 0 : index
    %c0_33 = arith.constant 0 : index
    %68 = vector.load %arg13[%c0_32, %c0_33] : memref<128x64xbf16, #tpu.memory_space<vmem>>, vector<128x64xbf16>
    %cst_34 = arith.constant dense<0.000000e+00> : vector<16x64xf32>
    %69 = tpu.matmul %67, %68, %cst_34 {dimension_numbers = #tpu.dot_dimension_numbers<[1], [0], [0], [1], [0, 0, 1, 1], [], []>} : vector<16x128xbf16>, vector<128x64xbf16>, vector<16x64xf32> -> vector<16x64xf32>
    %c0_35 = arith.constant 0 : index
    %c0_36 = arith.constant 0 : index
    %70 = vector.load %arg14[%c0_35, %c0_36] : memref<1x64xf32, #tpu.memory_space<vmem>>, vector<1x64xf32>
    %71 = vector.broadcast %70 : vector<1x64xf32> to vector<16x64xf32>
    %72 = arith.addf %69, %71 : vector<16x64xf32>
    %cst_37 = arith.constant 0.000000e+00 : f32
    %73 = vector.broadcast %cst_37 : f32 to vector<16x64xf32>
    %74 = arith.maximumf %72, %73 : vector<16x64xf32>
    %75 = arith.truncf %74 : vector<16x64xf32> to vector<16x64xbf16>
    %c0_38 = arith.constant 0 : index
    %c0_39 = arith.constant 0 : index
    %76 = vector.load %arg15[%c0_38, %c0_39] : memref<64x128xbf16, #tpu.memory_space<vmem>>, vector<64x128xbf16>
    %cst_40 = arith.constant dense<0.000000e+00> : vector<16x128xf32>
    %77 = tpu.matmul %75, %76, %cst_40 {dimension_numbers = #tpu.dot_dimension_numbers<[1], [0], [0], [1], [0, 0, 1, 1], [], []>} : vector<16x64xbf16>, vector<64x128xbf16>, vector<16x128xf32> -> vector<16x128xf32>
    %c0_41 = arith.constant 0 : index
    %c0_42 = arith.constant 0 : index
    %78 = vector.load %arg16[%c0_41, %c0_42] : memref<1x128xf32, #tpu.memory_space<vmem>>, vector<1x128xf32>
    %79 = vector.broadcast %78 : vector<1x128xf32> to vector<16x128xf32>
    %80 = arith.addf %77, %79 : vector<16x128xf32>
    %81 = math.tanh %80 : vector<16x128xf32>
    %cst_43 = arith.constant 1.000000e+00 : f32
    %82 = vector.broadcast %cst_43 : f32 to vector<16x128xf32>
    %83 = arith.mulf %81, %82 : vector<16x128xf32>
    %84 = arith.truncf %83 : vector<16x128xf32> to vector<16x128xbf16>
    %c0_44 = arith.constant 0 : index
    %c0_45 = arith.constant 0 : index
    %85 = vector.load %arg17[%c0_44, %c0_45] : memref<16x128xbf16, #tpu.memory_space<vmem>>, vector<16x128xbf16>
    tpu.vector_store %arg17[%c0_44, %c0_45], %84 {strides = array<i32>} : memref<16x128xbf16, #tpu.memory_space<vmem>>, vector<16x128xbf16>,
    return
  }
  func.func @transform_0(%arg0: i32) -> (i32, i32) {
    %c0_i32 = arith.constant 0 : i32
    %c0_i32_0 = arith.constant 0 : i32
    return %arg0, %c0_i32 : i32, i32
  }
  func.func @transform_1(%arg0: i32) -> (i32, i32, i32) {
    %c0_i32 = arith.constant 0 : i32
    %c0_i32_0 = arith.constant 0 : i32
    %c0_i32_1 = arith.constant 0 : i32
    return %c0_i32, %arg0, %c0_i32_0 : i32, i32, i32
  }
  func.func @transform_2(%arg0: i32) -> (i32, i32) {
    %c0_i32 = arith.constant 0 : i32
    %c0_i32_0 = arith.constant 0 : i32
    return %arg0, %c0_i32 : i32, i32
  }
  func.func @transform_3(%arg0: i32) -> (i32, i32) {
    %c0_i32 = arith.constant 0 : i32
    %c0_i32_0 = arith.constant 0 : i32
    %c0_i32_1 = arith.constant 0 : i32
    return %c0_i32, %c0_i32_0 : i32, i32
  }
  func.func @transform_4(%arg0: i32) -> (i32, i32) {
    %c0_i32 = arith.constant 0 : i32
    %c0_i32_0 = arith.constant 0 : i32
    %c0_i32_1 = arith.constant 0 : i32
    return %c0_i32, %c0_i32_0 : i32, i32
  }
  func.func @transform_5(%arg0: i32) -> (i32, i32) {
    %c0_i32 = arith.constant 0 : i32
    %c0_i32_0 = arith.constant 0 : i32
    %c0_i32_1 = arith.constant 0 : i32
    return %c0_i32, %c0_i32_0 : i32, i32
  }
  func.func @transform_6(%arg0: i32) -> (i32, i32) {
    %c0_i32 = arith.constant 0 : i32
    %c0_i32_0 = arith.constant 0 : i32
    %c0_i32_1 = arith.constant 0 : i32
    return %c0_i32, %c0_i32_0 : i32, i32
  }
  func.func @transform_7(%arg0: i32) -> (i32, i32) {
    %c0_i32 = arith.constant 0 : i32
    %c0_i32_0 = arith.constant 0 : i32
    %c0_i32_1 = arith.constant 0 : i32
    return %c0_i32, %c0_i32_0 : i32, i32
  }
  func.func @transform_8(%arg0: i32) -> (i32, i32) {
    %c0_i32 = arith.constant 0 : i32
    %c0_i32_0 = arith.constant 0 : i32
    %c0_i32_1 = arith.constant 0 : i32
    return %c0_i32, %c0_i32_0 : i32, i32
  }
  func.func @transform_9(%arg0: i32) -> (i32, i32) {
    %c0_i32 = arith.constant 0 : i32
    %c0_i32_0 = arith.constant 0 : i32
    %c0_i32_1 = arith.constant 0 : i32
    return %c0_i32, %c0_i32_0 : i32, i32
  }
  func.func @transform_10(%arg0: i32) -> (i32, i32) {
    %c0_i32 = arith.constant 0 : i32
    %c0_i32_0 = arith.constant 0 : i32
    %c0_i32_1 = arith.constant 0 : i32
    return %c0_i32, %c0_i32_0 : i32, i32
  }
  func.func @transform_11(%arg0: i32) -> (i32, i32) {
    %c0_i32 = arith.constant 0 : i32
    %c0_i32_0 = arith.constant 0 : i32
    %c0_i32_1 = arith.constant 0 : i32
    return %c0_i32, %c0_i32_0 : i32, i32
  }
  func.func @transform_12(%arg0: i32) -> (i32, i32) {
    %c0_i32 = arith.constant 0 : i32
    %c0_i32_0 = arith.constant 0 : i32
    %c0_i32_1 = arith.constant 0 : i32
    return %c0_i32, %c0_i32_0 : i32, i32
  }
  func.func @transform_13(%arg0: i32) -> (i32, i32) {
    %c0_i32 = arith.constant 0 : i32
    %c0_i32_0 = arith.constant 0 : i32
    %c0_i32_1 = arith.constant 0 : i32
    return %c0_i32, %c0_i32_0 : i32, i32
  }
  func.func @transform_14(%arg0: i32) -> (i32, i32) {
    %c0_i32 = arith.constant 0 : i32
    %c0_i32_0 = arith.constant 0 : i32
    %c0_i32_1 = arith.constant 0 : i32
    return %c0_i32, %c0_i32_0 : i32, i32
  }
  func.func @transform_15(%arg0: i32) -> (i32, i32) {
    %c0_i32 = arith.constant 0 : i32
    %c0_i32_0 = arith.constant 0 : i32
    %c0_i32_1 = arith.constant 0 : i32
    return %c0_i32, %c0_i32_0 : i32, i32
  }
  func.func @transform_16(%arg0: i32) -> (i32, i32) {
    %c0_i32 = arith.constant 0 : i32
    %c0_i32_0 = arith.constant 0 : i32
    return %arg0, %c0_i32 : i32, i32
  }
}

</mosaic_0001>

<bundles_post_ra>
// kernel: nn_controller_forward.1
= control target key start
LH: loop header
LB: loop body
LE: loop exit
PB: predicated region body
PF: predicated region fallthrough
CT: control target
= control target key end

     0   :  { %s2103_s0 = inlined_call_operand.vmem [shape: f32[32,8], index: 0, kind: input, shape index: {}]   ;;  %s2104_s1 = inlined_call_operand.vmem [shape: f32[8,32,8], index: 1, kind: input, shape index: {}]   ;;  %s2105_s2 = inlined_call_operand.vmem [shape: f32[32,11], index: 2, kind: input, shape index: {}]   ;;  %s2106_s3 = inlined_call_operand.vmem [shape: bf16[8,64], index: 3, kind: input, shape index: {}]   ;;  %s2107_s4 = inlined_call_operand.vmem [shape: f32[1,64], index: 4, kind: input, shape index: {}]   ;;  %s2108_s5 = inlined_call_operand.vmem [shape: bf16[64,128], index: 5, kind: input, shape index: {}]   ;;  %s2109_s6 = inlined_call_operand.vmem [shape: f32[1,128], index: 6, kind: input, shape index: {}]   ;;  %s2110_s7 = inlined_call_operand.vmem [shape: bf16[128,128], index: 7, kind: input, shape index: {}]   ;;  %s2111_s8 = inlined_call_operand.vmem [shape: f32[1,128], index: 8, kind: input, shape index: {}]   ;;  %s2112_s9 = inlined_call_operand.vmem [shape: bf16[128,128], index: 9, kind: input, shape index: {}]   ;;  %s2113_s10 = inlined_call_operand.vmem [shape: bf16[11,128], index: 10, kind: input, shape index: {}]   ;;  %s2114_s11 = inlined_call_operand.vmem [shape: f32[1,128], index: 11, kind: input, shape index: {}]   ;;  %s2115_s12 = inlined_call_operand.vmem [shape: bf16[128,64], index: 12, kind: input, shape index: {}]   ;;  %s2116_s13 = inlined_call_operand.vmem [shape: f32[1,64], index: 13, kind: input, shape index: {}]   ;;  %s2117_s14 = inlined_call_operand.vmem [shape: bf16[64,128], index: 14, kind: input, shape index: {}]   ;;  %s2118_s15 = inlined_call_operand.vmem [shape: f32[1,128], index: 15, kind: input, shape index: {}]   ;;  %s2119_s16 = inlined_call_operand.vmem [shape: bf16[32,128], index: 16, kind: output, shape index: {}]  }
   0x1   :  { %2120 = sst [smem:[#allocation3_spill]] %s2103_s0 }
   0x2   :  { %s1807_s21 = smov 0   ;;  %s1809_s22 = smov 0  }
   0x3   :  { %s1811_s23 = smov 0  }
   0x4 LB: > { %s1448_s24 = sadd.s32 4294967295, %s1719_s23   ;;  %s1824_s25 = sadd.s32 1, %s1719_s23   ;;  %s1719_s23 = sphi %s1811_s23, %s2124_s23   ;;  %s1715_s22 = sphi %s1809_s22, %s2123_s22   ;;  %s1711_s21 = sphi %s1807_s21, %s2122_s21  }
   0x5   : > { %s56_s26 = ssub.s32 %s1719_s23, %s1824_s25  ;;  %s59_s27 = sadd.s32 1, %s1715_s22 }
   0x6   : > { %p57_p0 = scmp.eq.s32.totalorder %s56_s26, 0  ;;  %p66_p1 = scmp.ne.s32.totalorder %s1715_s22, %s1711_s21 }
   0x7   : > { %p67_p2 = scmp.eq.s32.totalorder %s1719_s23, 0  ;;  %p1451_p4 = scmp.ge.s32.totalorder %s1719_s23, 2 }
   0x8   : > { %s1833_s28 = scalar_select %p57_p0, %s1715_s22, %s59_s27  }
   0x9   : > { %p68_p3 = por %p67_p2, %p66_p1  ;;  %456 = sbr.rel (%p1451_p4) target bundleno = 34 (0x22), region = 68 }
   0xe   : > { %468 = sbr.rel (!%p68_p3) target bundleno = 34 (0x22), region = 76  ;;  %s470_s29 = sand.u32 (%p68_p3), 1, %s1715_s22  }
   0xf   : > { %s1615_s30 = sshll.u32 (%p68_p3), %s1719_s23, 4  ;;  %s1452_s0 = sshll.u32 (%p68_p3), %s470_s29, 7 }
  0x10   : > { %s1841_s19 = scalar_lea.vmem (%p68_p3), %s2104_s1, %s1615_s30  ;;  %s472_s20 = scalar_lea.vmem (%p68_p3), [#allocation2], %s1452_s0 }
  0x11   : > { %v534_v0 = vld [vmem:[%s1841_s19] sm:$0xff] (%p68_p3)  ;;  %v536_v1 = vld [vmem:[%s1841_s19 + $0x8] sm:$0xff] (%p68_p3) }
  0x12   : > { %v538_v2 = vld [vmem:[%s1841_s19 + $0x20] sm:$0xff] (%p68_p3)  ;;  %535 = vst [vmem:[%s472_s20] sm:$0xff] (%p68_p3), %v534_v0  ;;  %v540_v3 = vld [vmem:[%s1841_s19 + $0x28] sm:$0xff] (%p68_p3) }
  0x13   : > { %537 = vst [vmem:[%s472_s20 + $0x8] sm:$0xff] %v536_v1  ;;  %v542_v4 = vld [vmem:[%s1841_s19 + $0x40] sm:$0xff]  ;;  %v544_v5 = vld [vmem:[%s1841_s19 + $0x48] sm:$0xff] }
  0x14   : > { %539 = vst [vmem:[%s472_s20 + $0x10] sm:$0xff] %v538_v2  ;;  %v546_v6 = vld [vmem:[%s1841_s19 + $0x60] sm:$0xff]  ;;  %v548_v7 = vld [vmem:[%s1841_s19 + $0x68] sm:$0xff] }
  0x15   : > { %541 = vst [vmem:[%s472_s20 + $0x18] sm:$0xff] %v540_v3  ;;  %v550_v8 = vld [vmem:[%s1841_s19 + $0x80] sm:$0xff]  ;;  %v552_v9 = vld [vmem:[%s1841_s19 + $0x88] sm:$0xff] }
  0x16   : > { %543 = vst [vmem:[%s472_s20 + $0x20] sm:$0xff] %v542_v4  ;;  %v554_v10 = vld [vmem:[%s1841_s19 + $0xa0] sm:$0xff]  ;;  %v556_v11 = vld [vmem:[%s1841_s19 + $0xa8] sm:$0xff] }
  0x17   : > { %545 = vst [vmem:[%s472_s20 + $0x28] sm:$0xff] %v544_v5  ;;  %v558_v12 = vld [vmem:[%s1841_s19 + $0xc0] sm:$0xff]  ;;  %v560_v13 = vld [vmem:[%s1841_s19 + $0xc8] sm:$0xff] }
  0x18   : > { %547 = vst [vmem:[%s472_s20 + $0x30] sm:$0xff] %v546_v6  ;;  %v562_v14 = vld [vmem:[%s1841_s19 + $0xe0] sm:$0xff]  ;;  %v564_v15 = vld [vmem:[%s1841_s19 + $0xe8] sm:$0xff] }
  0x19   : > { %549 = vst [vmem:[%s472_s20 + $0x38] sm:$0xff] %v548_v7 }
  0x1a   : > { %551 = vst [vmem:[%s472_s20 + $0x40] sm:$0xff] %v550_v8 }
  0x1b   : > { %553 = vst [vmem:[%s472_s20 + $0x48] sm:$0xff] %v552_v9 }
  0x1c   : > { %555 = vst [vmem:[%s472_s20 + $0x50] sm:$0xff] %v554_v10 }
  0x1d   : > { %557 = vst [vmem:[%s472_s20 + $0x58] sm:$0xff] %v556_v11 }
  0x1e   : > { %559 = vst [vmem:[%s472_s20 + $0x60] sm:$0xff] %v558_v12 }
  0x1f   : > { %561 = vst [vmem:[%s472_s20 + $0x68] sm:$0xff] %v560_v13 }
  0x20   : > { %563 = vst [vmem:[%s472_s20 + $0x70] sm:$0xff] %v562_v14 }
  0x21   : > { %565 = vst [vmem:[%s472_s20 + $0x78] sm:$0xff] %v564_v15 }
  0x22 PF: > { %p1455_p5 = scmp.ge.s32.totalorder %s1719_s23, 1  ;;  %p579_p6 = scmp.lt.s32.totalorder %s1719_s23, 3 }
  0x24   : > { %p580_p7 = pnand %p1455_p5, %p579_p6 }
  0x25   : > { %s586_s29 = sand.u32 (!%p580_p7), 1, %s1711_s21   ;;  %s1457_s30 = sshll.u32 (!%p580_p7), %s1448_s24, 1 }
  0x26   : > { %583 = sbr.rel (%p580_p7) target bundleno = 1042 (0x412), region = 118  ;;  %s1456_s0 = sshll.u32 (!%p580_p7), %s586_s29, 7 }
  0x27   : > { %p646_p8 = scmp.lt.s32.totalorder (!%p580_p7), %s1457_s30, 3  ;;  %s1869_s17 = scalar_lea.vmem (!%p580_p7), [#allocation2], %s1456_s0 }
  0x28   : > { %s2121_s24 = sld [smem:[#allocation3_spill]] (!%p580_p7) }
  0x2b   : > { %v709_v16 = vld [vmem:[%s2106_s3] sm:$0xf]  ;;  %vm739_vm0 = vcmask 1043456   ;;  %s2126_s30 = smov (!%p646_p8, %s1457_s30), 3  ;;  %v668_v19 = vld [vmem:[%s1869_s17 + $0x8] sm:$0xff]  ;;  %vm714_vm1 = vcmask 64512  }
  0x2c   : > { %v741_v17 = vsel %vm739_vm0, %v709_v16, 0  ;;  %v667_v18 = vld [vmem:[%s1869_s17] sm:$0xff]  ;;  %s1458_s18 = sshll.u32 %s2126_s30, 3  ;;  %v669_v25 = vld [vmem:[%s1869_s17 + $0x10] sm:$0xff]  ;;  %v670_v26 = vld [vmem:[%s1869_s17 + $0x18] sm:$0xff]  ;;  %vm852_vm2 = vcmask 523264  }
  0x2d   : > { %750 = vmatpush.bf16.msra.mxu0 %v741_v17  ;;  %v671_v30 = vld [vmem:[%s1869_s17 + $0x20] sm:$0xff]  ;;  %v672_v31 = vld [vmem:[%s1869_s17 + $0x28] sm:$0xff]  ;;  %v673_v35 = vld [vmem:[%s1869_s17 + $0x30] sm:$0xff]  ;;  %vm1126_vm3 = vcmask 1044480   ;;  %vm1127_vm4 = vcmask 1045504   ;;  %vm1122_vm5 = vcmask 89088  }
  0x2e   : > { %s649_s19 = scalar_lea.vmem %s2121_s24, %s1458_s18  ;;  %v674_v36 = vld [vmem:[%s1869_s17 + $0x38] sm:$0xff]  ;;  %v675_v40 = vld [vmem:[%s1869_s17 + $0x40] sm:$0xff]  ;;  %v676_v41 = vld [vmem:[%s1869_s17 + $0x48] sm:$0xff]  ;;  %s1462_s20 = sshll.u32 %s2126_s30, 2 }
  0x2f   : > { %v665_v20 = vld [vmem:[%s649_s19] sm:$0xff]  ;;  %v666_v21 = vld [vmem:[%s649_s19 + $0x8] sm:$0xff]  ;;  %v677_v45 = vld [vmem:[%s1869_s17 + $0x50] sm:$0xff]  ;;  %s656_s19 = scalar_lea.vmem %s2105_s2, %s1458_s18  ;;  %s662_s27 = scalar_lea.vmem %s2119_s16, %s1462_s20 }
  0x30   : > { %v685_v22 = vsub.f32 %v665_v20, %v667_v18  ;;  %v686_v23 = vsub.f32 %v666_v21, %v668_v19  ;;  %v687_v27 = vsub.f32 %v665_v20, %v669_v25  ;;  %v688_v28 = vsub.f32 %v666_v21, %v670_v26  ;;  %v678_v46 = vld [vmem:[%s1869_s17 + $0x58] sm:$0xff]  ;;  %v679_v50 = vld [vmem:[%s1869_s17 + $0x60] sm:$0xff]  ;;  %v680_v51 = vld [vmem:[%s1869_s17 + $0x68] sm:$0xff] }
  0x31   : > { %v689_v32 = vsub.f32 %v665_v20, %v671_v30  ;;  %v690_v33 = vsub.f32 %v666_v21, %v672_v31  ;;  %v691_v37 = vsub.f32 %v665_v20, %v673_v35  ;;  %v692_v38 = vsub.f32 %v666_v21, %v674_v36  ;;  %v1619_v54 = vld [vmem:[%s2108_s5 + $0x18] sm:$0xff]  ;;  %v1618_v56 = vld [vmem:[%s2108_s5 + $0x10] sm:$0xff]  ;;  %v1617_v57 = vld [vmem:[%s2108_s5 + $0x8] sm:$0xff] }
  0x32   : > { %v701_v24 = vpack.c.bf16 %v686_v23, %v685_v22  ;;  %v702_v29 = vpack.c.bf16 %v688_v28, %v687_v27  ;;  %v693_v42 = vsub.f32 %v665_v20, %v675_v40  ;;  %v694_v43 = vsub.f32 %v666_v21, %v676_v41  ;;  %881 = vmatpush.bf16.msra.mxu1 %v1619_v54  ;;  %v681_v58 = vld [vmem:[%s1869_s17 + $0x70] sm:$0xff]  ;;  %v682_v59 = vld [vmem:[%s1869_s17 + $0x78] sm:$0xff]  ;;  %v1616_v60 = vld [vmem:[%s2108_s5] sm:$0xff] }
  0x33   : > { %v703_v34 = vpack.c.bf16 %v690_v33, %v689_v32  ;;  %v704_v39 = vpack.c.bf16 %v692_v38, %v691_v37  ;;  %v695_v47 = vsub.f32 %v665_v20, %v677_v45  ;;  %v696_v48 = vsub.f32 %v666_v21, %v678_v46  ;;  %v1916_v1 = vld [vmem:[%s2107_s4] ss:$0 sm:$0xff]  ;;  %v1627_v40 = vld [vmem:[%s2110_s7 + $0x38] sm:$0xff]  ;;  %v1625_v46 = vld [vmem:[%s2110_s7 + $0x28] sm:$0xff] }
  0x34   : > { %1463 = vmatmul.msk.bf16.vlgmr.msra.gmra.mxu0 %vm714_vm1, %v701_v24  ;;  %v705_v44 = vpack.c.bf16 %v694_v43, %v693_v42  ;;  %v697_v52 = vsub.f32 %v665_v20, %v679_v50  ;;  %v698_v53 = vsub.f32 %v666_v21, %v680_v51  ;;  %v699_v61 = vsub.f32 %v665_v20, %v681_v58  ;;  %v1623_v51 = vld [vmem:[%s2110_s7 + $0x18] sm:$0xff]  ;;  %v1620_v58 = vld [vmem:[%s2110_s7] sm:$0xff] }
  0x35   : > { %v706_v49 = vpack.c.bf16 %v696_v48, %v695_v47  ;;  %v700_v62 = vsub.f32 %v666_v21, %v682_v59  ;;  %1018 = vmatpush.bf16.msra.mxu2 %v1627_v40  ;;  %1654 = vmatpush.bf16.msra.mxu3 %v1627_v40  ;;  %v1624_v47 = vld [vmem:[%s2110_s7 + $0x20] sm:$0xff] }
  0x36   : > { %v707_v55 = vpack.c.bf16 %v698_v53, %v697_v52  ;;  %882 = vmatpush.bf16.msra.mxu1 %v1618_v56 }
  0x37   : > { %v708_v63 = vpack.c.bf16 %v700_v62, %v699_v61 }
  0x3a   : > { %883 = vmatpush.bf16.msra.mxu1 %v1617_v57  ;;  %v1621_v57 = vld [vmem:[%s2110_s7 + $0x8] sm:$0xff] }
  0x3e   : > { %884 = vmatpush.bf16.msra.mxu1 %v1616_v60 }
  0x44   : > { %1464 = vmatmul.msk.bf16.gmra.mxu0 %vm714_vm1, %v702_v29 }
  0x54   : > { %1465 = vmatmul.msk.bf16.gmra.mxu0 %vm714_vm1, %v703_v34 }
  0x64   : > { %1466 = vmatmul.msk.bf16.gmra.mxu0 %vm714_vm1, %v704_v39 }
  0x74   : > { %1467 = vmatmul.msk.bf16.gmra.mxu0 %vm714_vm1, %v705_v44  ;;  %v1626_v44 = vld [vmem:[%s2110_s7 + $0x30] sm:$0xff] }
  0x75   : > { %1019 = vmatpush.bf16.msra.mxu2 %v1626_v44  ;;  %1655 = vmatpush.bf16.msra.mxu3 %v1626_v44 }
  0x79   : > { %1020 = vmatpush.bf16.msra.mxu2 %v1625_v46  ;;  %1656 = vmatpush.bf16.msra.mxu3 %v1625_v46 }
  0x7d   : > { %1021 = vmatpush.bf16.msra.mxu2 %v1624_v47  ;;  %1657 = vmatpush.bf16.msra.mxu3 %v1624_v47 }
  0x81   : > { %1022 = vmatpush.bf16.msra.mxu2 %v1623_v51  ;;  %1658 = vmatpush.bf16.msra.mxu3 %v1623_v51 }
  0x84   : > { %1468 = vmatmul.msk.bf16.gmra.mxu0 %vm714_vm1, %v706_v49 }
  0x94   : > { %1469 = vmatmul.msk.bf16.gmra.mxu0 %vm714_vm1, %v707_v55  ;;  %v1622_v55 = vld [vmem:[%s2110_s7 + $0x10] sm:$0xff] }
  0x95   : > { %1023 = vmatpush.bf16.msra.mxu2 %v1622_v55  ;;  %1659 = vmatpush.bf16.msra.mxu3 %v1622_v55 }
  0x99   : > { %1024 = vmatpush.bf16.msra.mxu2 %v1621_v57  ;;  %1660 = vmatpush.bf16.msra.mxu3 %v1621_v57 }
  0x9d   : > { %1025 = vmatpush.bf16.msra.mxu2 %v1620_v58  ;;  %1661 = vmatpush.bf16.msra.mxu3 %v1620_v58 }
  0xa4   : > { %1470 = vmatmul.msk.bf16.gmra.mxu0 %vm714_vm1, %v708_v63 }
  0xb1   : > { %v752_v0 = vpop.f32.mrf.mxu0 }
  0xb2   : > { %v753_v2 = vadd.f32 %v1916_v1, %v752_v0 }
  0xb4   : > { %v792_v5 = vmax.f32 %v753_v2, 0.0 }
  0xb9   : > { %v754_v3 = vpop.f32.mrf.mxu0 }
  0xba   : > { %v755_v4 = vadd.f32 %v1916_v1, %v754_v3  ;;  %v1688_v3 = vld [vmem:[%s2109_s6] ss:$0 sm:$0xff] }
  0xbc   : > { %v793_v6 = vmax.f32 %v755_v4, 0.0 }
  0xbe   : > { %v808_v7 = vpack.c.bf16 %v793_v6, %v792_v5 }
  0xc0   : > { %1487 = vmatmul.msk.bf16.vlgmr.msra.gmra.mxu1 %vm852_vm2, %v808_v7 }
  0xc1   : > { %v757_v8 = vpop.f32.mrf.mxu0 }
  0xc2   : > { %v758_v9 = vadd.f32 %v1916_v1, %v757_v8 }
  0xc4   : > { %v794_v12 = vmax.f32 %v758_v9, 0.0 }
  0xc9   : > { %v759_v10 = vpop.f32.mrf.mxu0 }
  0xca   : > { %v760_v11 = vadd.f32 %v1916_v1, %v759_v10 }
  0xcc   : > { %v795_v13 = vmax.f32 %v760_v11, 0.0 }
  0xce   : > { %v809_v14 = vpack.c.bf16 %v795_v13, %v794_v12 }
  0xd0   : > { %1488 = vmatmul.msk.bf16.gmra.mxu1 %vm852_vm2, %v809_v14 }
  0xd1   : > { %v762_v15 = vpop.f32.mrf.mxu0 }
  0xd2   : > { %v763_v16 = vadd.f32 %v1916_v1, %v762_v15 }
  0xd4   : > { %v796_v19 = vmax.f32 %v763_v16, 0.0 }
  0xd9   : > { %v764_v17 = vpop.f32.mrf.mxu0 }
  0xda   : > { %v765_v18 = vadd.f32 %v1916_v1, %v764_v17 }
  0xdc   : > { %v797_v20 = vmax.f32 %v765_v18, 0.0 }
  0xde   : > { %v810_v21 = vpack.c.bf16 %v797_v20, %v796_v19 }
  0xe0   : > { %1489 = vmatmul.msk.bf16.gmra.mxu1 %vm852_vm2, %v810_v21 }
  0xe1   : > { %v767_v22 = vpop.f32.mrf.mxu0 }
  0xe2   : > { %v768_v23 = vadd.f32 %v1916_v1, %v767_v22 }
  0xe4   : > { %v798_v26 = vmax.f32 %v768_v23, 0.0 }
  0xe9   : > { %v769_v24 = vpop.f32.mrf.mxu0 }
  0xea   : > { %v770_v25 = vadd.f32 %v1916_v1, %v769_v24 }
  0xec   : > { %v799_v27 = vmax.f32 %v770_v25, 0.0 }
  0xee   : > { %v811_v28 = vpack.c.bf16 %v799_v27, %v798_v26 }
  0xf0   : > { %1490 = vmatmul.msk.bf16.gmra.mxu1 %vm852_vm2, %v811_v28 }
  0xf1   : > { %v772_v29 = vpop.f32.mrf.mxu0 }
  0xf2   : > { %v773_v30 = vadd.f32 %v1916_v1, %v772_v29 }
  0xf4   : > { %v800_v33 = vmax.f32 %v773_v30, 0.0 }
  0xf9   : > { %v774_v31 = vpop.f32.mrf.mxu0 }
  0xfa   : > { %v775_v32 = vadd.f32 %v1916_v1, %v774_v31 }
  0xfc   : > { %v801_v34 = vmax.f32 %v775_v32, 0.0 }
  0xfe   : > { %v812_v35 = vpack.c.bf16 %v801_v34, %v800_v33 }
 0x100   : > { %1491 = vmatmul.msk.bf16.gmra.mxu1 %vm852_vm2, %v812_v35 }
 0x101   : > { %v777_v36 = vpop.f32.mrf.mxu0 }
 0x102   : > { %v778_v37 = vadd.f32 %v1916_v1, %v777_v36 }
 0x104   : > { %v802_v41 = vmax.f32 %v778_v37, 0.0 }
 0x109   : > { %v779_v38 = vpop.f32.mrf.mxu0 }
 0x10a   : > { %v780_v39 = vadd.f32 %v1916_v1, %v779_v38 }
 0x10c   : > { %v803_v42 = vmax.f32 %v780_v39, 0.0 }
 0x10e   : > { %v813_v43 = vpack.c.bf16 %v803_v42, %v802_v41 }
 0x110   : > { %1492 = vmatmul.msk.bf16.gmra.mxu1 %vm852_vm2, %v813_v43 }
 0x111   : > { %v782_v45 = vpop.f32.mrf.mxu0 }
 0x112   : > { %v783_v48 = vadd.f32 %v1916_v1, %v782_v45 }
 0x114   : > { %v804_v52 = vmax.f32 %v783_v48, 0.0 }
 0x119   : > { %v784_v49 = vpop.f32.mrf.mxu0 }
 0x11a   : > { %v785_v50 = vadd.f32 %v1916_v1, %v784_v49 }
 0x11c   : > { %v805_v53 = vmax.f32 %v785_v50, 0.0 }
 0x11e   : > { %v814_v54 = vpack.c.bf16 %v805_v53, %v804_v52 }
 0x120   : > { %1493 = vmatmul.msk.bf16.gmra.mxu1 %vm852_vm2, %v814_v54 }
 0x121   : > { %v787_v56 = vpop.f32.mrf.mxu0 }
 0x122   : > { %v788_v59 = vadd.f32 %v1916_v1, %v787_v56 }
 0x124   : > { %v806_v62 = vmax.f32 %v788_v59, 0.0 }
 0x129   : > { %v789_v60 = vpop.f32.mrf.mxu0 }
 0x12a   : > { %v790_v61 = vadd.f32 %v1916_v1, %v789_v60  ;;  %v1972_v60 = vld [vmem:[%s2111_s8] ss:$0 sm:$0xff] }
 0x12c   : > { %v807_v63 = vmax.f32 %v790_v61, 0.0 }
 0x12e   : > { %v815_v0 = vpack.c.bf16 %v807_v63, %v806_v62 }
 0x130   : > { %1494 = vmatmul.msk.bf16.gmra.mxu1 %vm852_vm2, %v815_v0 }
 0x13d   : > { %v886_v2 = vpop.f32.mrf.mxu1 }
 0x13e   : > { %v887_v4 = vadd.f32 %v1688_v3, %v886_v2 }
 0x140   : > { %v926_v7 = vmax.f32 %v887_v4, 0.0 }
 0x145   : > { %v888_v5 = vpop.f32.mrf.mxu1 }
 0x146   : > { %v889_v6 = vadd.f32 %v1688_v3, %v888_v5 }
 0x148   : > { %v927_v8 = vmax.f32 %v889_v6, 0.0 }
 0x14a   : > { %v942_v9 = vpack.c.bf16 %v927_v8, %v926_v7 }
 0x14c   : > { %1026 = vmatmul.bf16.vlgmr.msra.gmra.mxu2 %v942_v9 }
 0x14d   : > { %v891_v10 = vpop.f32.mrf.mxu1 }
 0x14e   : > { %v892_v11 = vadd.f32 %v1688_v3, %v891_v10 }
 0x150   : > { %v928_v13 = vmax.f32 %v892_v11, 0.0 }
 0x155   : > { %v893_v1 = vpop.f32.mrf.mxu1 }
 0x156   : > { %v894_v12 = vadd.f32 %v1688_v3, %v893_v1 }
 0x158   : > { %v929_v14 = vmax.f32 %v894_v12, 0.0 }
 0x15a   : > { %v943_v15 = vpack.c.bf16 %v929_v14, %v928_v13 }
 0x15c   : > { %1031 = vmatmul.bf16.gmra.mxu2 %v943_v15 }
 0x15d   : > { %v896_v16 = vpop.f32.mrf.mxu1 }
 0x15e   : > { %v897_v17 = vadd.f32 %v1688_v3, %v896_v16 }
 0x160   : > { %v930_v20 = vmax.f32 %v897_v17, 0.0 }
 0x165   : > { %v898_v18 = vpop.f32.mrf.mxu1 }
 0x166   : > { %v899_v19 = vadd.f32 %v1688_v3, %v898_v18 }
 0x168   : > { %v931_v21 = vmax.f32 %v899_v19, 0.0 }
 0x16a   : > { %v944_v22 = vpack.c.bf16 %v931_v21, %v930_v20 }
 0x16c   : > { %1036 = vmatmul.bf16.gmra.mxu2 %v944_v22 }
 0x16d   : > { %v901_v23 = vpop.f32.mrf.mxu1 }
 0x16e   : > { %v902_v24 = vadd.f32 %v1688_v3, %v901_v23 }
 0x170   : > { %v932_v27 = vmax.f32 %v902_v24, 0.0 }
 0x175   : > { %v903_v25 = vpop.f32.mrf.mxu1 }
 0x176   : > { %v904_v26 = vadd.f32 %v1688_v3, %v903_v25  ;;  %v1529_v25 = vld [vmem:[%s2113_s10] sm:$0xf] }
 0x178   : > { %v933_v28 = vmax.f32 %v904_v26, 0.0  ;;  %v1636_v26 = vld [vmem:[%s2113_s10] sm:$0x30] }
 0x17a   : > { %v945_v29 = vpack.c.bf16 %v933_v28, %v932_v27  ;;  %v1530_v27 = vor.u32 %v1636_v26, %v1529_v25  ;;  %v1721_v28 = vmov 65535   ;;  %v1690_v25 = vld [vmem:[%s2114_s11] ss:$0 sm:$0xff] }
 0x17c   : > { %1041 = vmatmul.bf16.gmra.mxu2 %v945_v29  ;;  %v1128_v29 = vsel %vm1126_vm3, 4294967295, %v1721_v28 }
 0x17d   : > { %v906_v30 = vpop.f32.mrf.mxu1 }
 0x17e   : > { %v907_v31 = vadd.f32 %v1688_v3, %v906_v30 }
 0x180   : > { %v934_v34 = vmax.f32 %v907_v31, 0.0  ;;  %v1129_v31 = vsel %vm1127_vm4, %v1128_v29, 0 }
 0x185   : > { %v908_v32 = vpop.f32.mrf.mxu1 }
 0x186   : > { %v909_v33 = vadd.f32 %v1688_v3, %v908_v32  ;;  %v1131_v32 = vand.u32 %v1530_v27, %v1129_v31 }
 0x188   : > { %v935_v35 = vmax.f32 %v909_v33, 0.0  ;;  %v1635_v33 = vld [vmem:[%s2112_s9 + $0x38] sm:$0xff]  ;;  %1140 = vmatpush.bf16.msrb.mxu3 %v1131_v32 }
 0x18a   : > { %v946_v36 = vpack.c.bf16 %v935_v35, %v934_v34  ;;  %v1634_v34 = vld [vmem:[%s2112_s9 + $0x30] sm:$0xff]  ;;  %v683_v35 = vld [vmem:[%s656_s19] sm:$0xff] }
 0x18c   : > { %1046 = vmatmul.bf16.gmra.mxu2 %v946_v36  ;;  %v684_v36 = vld [vmem:[%s656_s19 + $0x8] sm:$0xff] }
 0x18d   : > { %v911_v37 = vpop.f32.mrf.mxu1 }
 0x18e   : > { %v912_v38 = vadd.f32 %v1688_v3, %v911_v37  ;;  %v1114_v37 = vpack.c.bf16 %v684_v36, %v683_v35  ;;  %v1645_v35 = vld [vmem:[%s2117_s14] sm:$0xff] }
 0x190   : > { %v936_v41 = vmax.f32 %v912_v38, 0.0  ;;  %v1633_v38 = vld [vmem:[%s2112_s9 + $0x28] sm:$0xff] }
 0x195   : > { %v913_v39 = vpop.f32.mrf.mxu1 }
 0x196   : > { %v914_v40 = vadd.f32 %v1688_v3, %v913_v39 }
 0x198   : > { %v937_v42 = vmax.f32 %v914_v40, 0.0  ;;  %v1632_v40 = vld [vmem:[%s2112_s9 + $0x20] sm:$0xff] }
 0x19a   : > { %v947_v43 = vpack.c.bf16 %v937_v42, %v936_v41  ;;  %v1631_v41 = vld [vmem:[%s2112_s9 + $0x18] sm:$0xff] }
 0x19c   : > { %1051 = vmatmul.bf16.gmra.mxu2 %v947_v43  ;;  %v1630_v43 = vld [vmem:[%s2112_s9 + $0x10] sm:$0xff] }
 0x19d   : > { %v916_v44 = vpop.f32.mrf.mxu1 }
 0x19e   : > { %v917_v45 = vadd.f32 %v1688_v3, %v916_v44  ;;  %v1629_v44 = vld [vmem:[%s2112_s9 + $0x8] sm:$0xff] }
 0x1a0   : > { %v938_v48 = vmax.f32 %v917_v45, 0.0 }
 0x1a5   : > { %v918_v46 = vpop.f32.mrf.mxu1 }
 0x1a6   : > { %v919_v47 = vadd.f32 %v1688_v3, %v918_v46  ;;  %v1628_v46 = vld [vmem:[%s2112_s9] sm:$0xff] }
 0x1a8   : > { %v939_v49 = vmax.f32 %v919_v47, 0.0 }
 0x1aa   : > { %v948_v50 = vpack.c.bf16 %v939_v49, %v938_v48 }
 0x1ac   : > { %1056 = vmatmul.bf16.gmra.mxu2 %v948_v50 }
 0x1ad   : > { %v921_v51 = vpop.f32.mrf.mxu1 }
 0x1ae   : > { %v922_v52 = vadd.f32 %v1688_v3, %v921_v51 }
 0x1b0   : > { %v940_v55 = vmax.f32 %v922_v52, 0.0 }
 0x1b5   : > { %v923_v53 = vpop.f32.mrf.mxu1 }
 0x1b6   : > { %v924_v54 = vadd.f32 %v1688_v3, %v923_v53 }
 0x1b8   : > { %v941_v56 = vmax.f32 %v924_v54, 0.0 }
 0x1ba   : > { %v949_v57 = vpack.c.bf16 %v941_v56, %v940_v55 }
 0x1bc   : > { %1061 = vmatmul.bf16.vlgmr.msra.gmra.mxu3 %v949_v57 }
 0x1bd   : > { %1195 = vmatpush.bf16.msra.mxu3 %v1635_v33  ;;  %v1647_v33 = vld [vmem:[%s2117_s14 + $0x10] sm:$0xff] }
 0x1c1   : > { %1196 = vmatpush.bf16.msra.mxu3 %v1634_v34  ;;  %v1646_v34 = vld [vmem:[%s2117_s14 + $0x8] sm:$0xff] }
 0x1c5   : > { %1197 = vmatpush.bf16.msra.mxu3 %v1633_v38 }
 0x1c9   : > { %1198 = vmatpush.bf16.msra.mxu3 %v1632_v40 }
 0x1cc   : > { %1531 = vmatmul.msk.bf16.vlgmr.msrb.gmra.mxu3 %vm1122_vm5, %v1114_v37  ;;  %v1691_v37 = vld [vmem:[%s2116_s13] ss:$0 sm:$0xff] }
 0x1cd   : > { %1199 = vmatpush.bf16.msra.mxu3 %v1631_v41 }
 0x1cf   : > { %v1027_v58 = vpop.f32.mrf.mxu2 }
 0x1d0   : > { %v1028_v61 = vadd.f32 %v1972_v60, %v1027_v58 }
 0x1d1   : > { %1200 = vmatpush.bf16.msra.mxu3 %v1630_v43 }
 0x1d2   : > { %v1067_v0 = vmax.f32 %v1028_v61, 0.0 }
 0x1d5   : > { %1201 = vmatpush.bf16.msra.mxu3 %v1629_v44 }
 0x1d7   : > { %v1029_v59 = vpop.f32.mrf.mxu2 }
 0x1d8   : > { %v1030_v3 = vadd.f32 %v1972_v60, %v1029_v59 }
 0x1d9   : > { %1202 = vmatpush.bf16.msra.mxu3 %v1628_v46 }
 0x1da   : > { %v1068_v7 = vmax.f32 %v1030_v3, 0.0 }
 0x1df   : > { %v1032_v62 = vpop.f32.mrf.mxu2 }
 0x1e0   : > { %v1033_v63 = vadd.f32 %v1972_v60, %v1032_v62 }
 0x1e2   : > { %v1069_v2 = vmax.f32 %v1033_v63, 0.0 }
 0x1e4   : > { %v1976_v4 = vmax.f32 %v1067_v0, %v1069_v2 }
 0x1e7   : > { %v1034_v5 = vpop.f32.mrf.mxu2 }
 0x1e8   : > { %v1035_v6 = vadd.f32 %v1972_v60, %v1034_v5 }
 0x1ea   : > { %v1070_v8 = vmax.f32 %v1035_v6, 0.0 }
 0x1ec   : > { %v1980_v9 = vmax.f32 %v1068_v7, %v1070_v8 }
 0x1ef   : > { %v1037_v10 = vpop.f32.mrf.mxu2 }
 0x1f0   : > { %v1038_v1 = vadd.f32 %v1972_v60, %v1037_v10 }
 0x1f2   : > { %v1071_v14 = vmax.f32 %v1038_v1, 0.0 }
 0x1f7   : > { %v1039_v11 = vpop.f32.mrf.mxu2 }
 0x1f8   : > { %v1040_v17 = vadd.f32 %v1972_v60, %v1039_v11 }
 0x1fa   : > { %v1072_v21 = vmax.f32 %v1040_v17, 0.0  ;;  %v1639_v17 = vld [vmem:[%s2115_s12 + $0x10] sm:$0xff] }
 0x1ff   : > { %v1042_v12 = vpop.f32.mrf.mxu2 }
 0x200   : > { %v1043_v13 = vadd.f32 %v1972_v60, %v1042_v12 }
 0x202   : > { %v1073_v15 = vmax.f32 %v1043_v13, 0.0 }
 0x204   : > { %v1984_v16 = vmax.f32 %v1071_v14, %v1073_v15  ;;  %v1643_v15 = vld [vmem:[%s2115_s12 + $0x30] sm:$0xff] }
 0x206   : > { %v1091_v18 = vmax.f32 %v1976_v4, %v1984_v16  ;;  %v1642_v4 = vld [vmem:[%s2115_s12 + $0x28] sm:$0xff]  ;;  %v1640_v16 = vld [vmem:[%s2115_s12 + $0x18] sm:$0xff] }
 0x207   : > { %v1044_v19 = vpop.f32.mrf.mxu2 }
 0x208   : > { %v1045_v20 = vadd.f32 %v1972_v60, %v1044_v19  ;;  %v1637_v19 = vld [vmem:[%s2115_s12] sm:$0xff] }
 0x20a   : > { %v1074_v22 = vmax.f32 %v1045_v20, 0.0 }
 0x20c   : > { %v1990_v23 = vmax.f32 %v1072_v21, %v1074_v22  ;;  %v1648_v21 = vld [vmem:[%s2117_s14 + $0x18] sm:$0xff] }
 0x20e   : > { %v1092_v24 = vmax.f32 %v1980_v9, %v1990_v23  ;;  %v1641_v9 = vld [vmem:[%s2115_s12 + $0x20] sm:$0xff] }
 0x20f   : > { %v1047_v30 = vpop.f32.mrf.mxu2 }
 0x210   : > { %v1048_v53 = vadd.f32 %v1972_v60, %v1047_v30 }
 0x212   : > { %v1075_v62 = vmax.f32 %v1048_v53, 0.0 }
 0x217   : > { %v1049_v39 = vpop.f32.mrf.mxu2 }
 0x218   : > { %v1050_v56 = vadd.f32 %v1972_v60, %v1049_v39 }
 0x21a   : > { %v1076_v3 = vmax.f32 %v1050_v56, 0.0 }
 0x21f   : > { %v1052_v42 = vpop.f32.mrf.mxu2 }
 0x220   : > { %v1053_v50 = vadd.f32 %v1972_v60, %v1052_v42 }
 0x222   : > { %v1077_v57 = vmax.f32 %v1053_v50, 0.0 }
 0x224   : > { %v1087_v5 = vmax.f32 %v1075_v62, %v1077_v57 }
 0x227   : > { %v1054_v45 = vpop.f32.mrf.mxu2 }
 0x228   : > { %v1055_v54 = vadd.f32 %v1972_v60, %v1054_v45  ;;  %v1692_v45 = vld [vmem:[%s2118_s15] ss:$0 sm:$0xff] }
 0x22a   : > { %v1078_v63 = vmax.f32 %v1055_v54, 0.0 }
 0x22c   : > { %v1088_v8 = vmax.f32 %v1076_v3, %v1078_v63 }
 0x22f   : > { %v1057_v47 = vpop.f32.mrf.mxu2 }
 0x230   : > { %v1058_v51 = vadd.f32 %v1972_v60, %v1057_v47 }
 0x232   : > { %v1079_v58 = vmax.f32 %v1058_v51, 0.0 }
 0x237   : > { %v1059_v52 = vpop.f32.mrf.mxu2 }
 0x238   : > { %v1060_v59 = vadd.f32 %v1972_v60, %v1059_v52 }
 0x23a   : > { %v1080_v6 = vmax.f32 %v1060_v59, 0.0 }
 0x23f   : > { %v1062_v48 = vpop.f32.mrf.mxu3 }
 0x240   : > { %v1063_v49 = vadd.f32 %v1972_v60, %v1062_v48 }
 0x242   : > { %v1081_v55 = vmax.f32 %v1063_v49, 0.0 }
 0x244   : > { %v1089_v0 = vmax.f32 %v1079_v58, %v1081_v55 }
 0x246   : > { %v1093_v10 = vmax.f32 %v1087_v5, %v1089_v0 }
 0x247   : > { %v1064_v61 = vpop.f32.mrf.mxu3 }
 0x248   : > { %v1065_v2 = vadd.f32 %v1972_v60, %v1064_v61  ;;  %v1095_v12 = vmax.f32 %v1091_v18, %v1093_v10  ;;  %v1644_v60 = vld [vmem:[%s2115_s12 + $0x38] sm:$0xff]  ;;  %v1638_v18 = vld [vmem:[%s2115_s12 + $0x8] sm:$0xff] }
 0x249   : > { %1286 = vmatpush.bf16.msrb.mxu3 %v1644_v60 }
 0x24a   : > { %v1082_v7 = vmax.f32 %v1065_v2, 0.0 }
 0x24c   : > { %v1090_v11 = vmax.f32 %v1080_v6, %v1082_v7 }
 0x24d   : > { %1287 = vmatpush.bf16.msrb.mxu3 %v1643_v15 }
 0x24e   : > { %v1094_v1 = vmax.f32 %v1088_v8, %v1090_v11 }
 0x24f   : > { %v1142_v20 = vpop.f32.mrf.mxu3 }
 0x250   : > { %v1096_v13 = vmax.f32 %v1092_v24, %v1094_v1 }
 0x251   : > { %1288 = vmatpush.bf16.msrb.mxu3 %v1642_v4 }
 0x252   : > { %v1097_v14 = vpack.c.bf16 %v1096_v13, %v1095_v12 }
 0x254   : > { %1203 = vmatmul.bf16.vlgmr.msra.gmra.mxu3 %v1097_v14 }
 0x255   : > { %1289 = vmatpush.bf16.msrb.mxu3 %v1641_v9 }
 0x257   : > { %v1144_v22 = vpop.f32.mrf.mxu3 }
 0x259   : > { %1290 = vmatpush.bf16.msrb.mxu3 %v1640_v16 }
 0x25d   : > { %1291 = vmatpush.bf16.msrb.mxu3 %v1639_v17 }
 0x261   : > { %1292 = vmatpush.bf16.msrb.mxu3 %v1638_v18 }
 0x265   : > { %1293 = vmatpush.bf16.msrb.mxu3 %v1637_v19 }
 0x269   : > { %1346 = vmatpush.bf16.msra.mxu3 %v1648_v21 }
 0x26d   : > { %1347 = vmatpush.bf16.msra.mxu3 %v1647_v33 }
 0x271   : > { %1348 = vmatpush.bf16.msra.mxu3 %v1646_v34 }
 0x275   : > { %1349 = vmatpush.bf16.msra.mxu3 %v1645_v35 }
 0x2d7   : > { %v1204_v23 = vpop.f32.mrf.mxu3 }
 0x2d8   : > { %v1205_v24 = vadd.f32 %v1204_v23, %v1142_v20 }
 0x2da   : > { %v1213_v27 = vadd.f32 %v1690_v25, %v1205_v24 }
 0x2dc   : > { %v1215_v30 = vmax.f32 %v1213_v27, 0.0 }
 0x2df   : > { %v1206_v26 = vpop.f32.mrf.mxu3 }
 0x2e0   : > { %v1207_v28 = vadd.f32 %v1206_v26, %v1144_v22 }
 0x2e2   : > { %v1214_v29 = vadd.f32 %v1690_v25, %v1207_v28 }
 0x2e4   : > { %v1216_v31 = vmax.f32 %v1214_v29, 0.0 }
 0x2e6   : > { %v1217_v32 = vpack.c.bf16 %v1216_v31, %v1215_v30 }
 0x2e8   : > { %1294 = vmatmul.bf16.vlgmr.msrb.gmra.mxu3 %v1217_v32 }
 0x36b   : > { %v1295_v36 = vpop.f32.mrf.mxu3 }
 0x36c   : > { %v1296_v38 = vadd.f32 %v1691_v37, %v1295_v36 }
 0x36e   : > { %v1300_v41 = vmax.f32 %v1296_v38, 0.0 }
 0x373   : > { %v1297_v39 = vpop.f32.mrf.mxu3 }
 0x374   : > { %v1298_v40 = vadd.f32 %v1691_v37, %v1297_v39 }
 0x376   : > { %v1301_v42 = vmax.f32 %v1298_v40, 0.0 }
 0x378   : > { %v1302_v43 = vpack.c.bf16 %v1301_v42, %v1300_v41 }
 0x37a   : > { %1612 = vmatmul.msk.bf16.vlgmr.msra.gmra.mxu3 %vm852_vm2, %v1302_v43 }
 0x3fd   : > { %v1351_v44 = vpop.f32.mrf.mxu3 }
 0x3fe   : > { %v1352_v46 = vadd.f32 %v1692_v45, %v1351_v44 }
 0x400   : > { %1693 = vtanh.f32 %v1352_v46 }
 0x405   : > { %v1353_v47 = vpop.f32.mrf.mxu3 }
 0x406   : > { %v1354_v48 = vadd.f32 %v1692_v45, %v1353_v47  ;;  %v1694_v49 = vpop.eup %1693 }
 0x408   : > { %1695 = vtanh.f32 %v1354_v48 }
 0x40e   : > { %v1696_v50 = vpop.eup %1695 }
 0x40f   : > { %v1652_v51 = vpack.c.bf16 %v1696_v50, %v1694_v49 }
 0x411   : > { %1653 = vst [vmem:[%s662_s27] sm:$0xff] %v1652_v51  }
 0x412 PF: > { %p23_p9 = scmp.ge.s32.totalorder %s1824_s25, 4   ;;  %s2122_s21 = smov %s1715_s22 }
 0x413   : > { %s2123_s22 = smov %s1833_s28  ;;  %s2124_s23 = smov %s1824_s25 }
 0x414   :  { %25 = sbr.rel (!%p23_p9) target bundleno = 4 (0x4), region = 163 }

</bundles_post_ra>
